<compile_context>
chip_gen: v7x
topology: tpu7x:2x2x1
jax: 0.10.0
libtpu: 0.0.40
codegen_flags: <defaults>
</compile_context>

<pallas_src>
import functools

import jax
import jax.numpy as jnp
from jax.experimental import pallas as pl
from jax.experimental.pallas import tpu as pltpu

_LANE = 128
_SUBLANE = 8
_ALIGN = _SUBLANE * _LANE       # 1024 elements = one f32 vreg worth of data


def _focal_terms(x, t, alpha, gamma):
    """Elementwise focal-loss terms in pure JAX (used only for the tiny tail)."""
    x = x.astype(jnp.float32)
    t = t.astype(jnp.float32)
    bce = jnp.maximum(x, 0.0) - x * t + jnp.log1p(jnp.exp(-jnp.abs(x)))
    pt = jnp.exp(-bce)
    return alpha * (1.0 - pt) ** gamma * bce


def _focal_loss_kernel(x_ref, t_ref, out_ref, *,
                       alpha, gamma, last_rows, binary_targets):
    """One (tile_rows, 128) block -> one (8, 128) f32 vector of partial sums.

    x_ref, t_ref : VMEM [tile_rows, 128] (native dtype, cast to f32 here)
    out_ref      : VMEM [8, 128] f32 per-program partial sum (leading grid dim
                   of the output is squeezed by the BlockSpec)
    """
    pid = pl.program_id(0)
    is_last = pid == pl.num_programs(0) - 1

    x = x_ref[...].astype(jnp.float32)
    t = t_ref[...].astype(jnp.float32)

    # Stable BCE-with-logits (StableBCELoss, reduction='none').
    u = jnp.exp(-jnp.abs(x))
    bce = jnp.maximum(x, 0.0) - x * t + jnp.log1p(u)

    if binary_targets:
        # pt = exp(-bce) = exp(-(relu(x) - x*t)) / (1 + u).  For t in {0,1} the
        # numerator is a pure select on u, so one EUP exp becomes a cheap
        # approximate reciprocal.  Only valid for hard binary targets.
        one = jnp.float32(1.0)
        num = jnp.where(t > 0.5,
                        jnp.where(x > 0.0, one, u),
                        jnp.where(x > 0.0, u, one))
        pt = num * pl.reciprocal(one + u, approx=True)
    else:
        pt = jnp.exp(-bce)

    om = 1.0 - pt
    if float(gamma) == 2.0:
        w = om * om                                  # VPU square, no EUP pow
    elif float(gamma) == 1.0:
        w = om
    else:
        # Clamp avoids NaN from tiny negative (1 - pt) with fractional gamma.
        w = jnp.power(jnp.maximum(om, 0.0), jnp.float32(gamma))
    f = w * bce if float(alpha) == 1.0 else (jnp.float32(alpha) * w) * bce

    rows = f.shape[0]

    def _rowsum(v):
        # (rows, 128) -> (rows//8, 8, 128) -> (8, 128): vreg-granular VPU adds,
        # no XLU cross-lane reduce and no vector->SMEM-scalar round trip.
        return jnp.sum(v.reshape(rows // _SUBLANE, _SUBLANE, _LANE), axis=0)

    if last_rows < rows:
        # Only the final block can be ragged; its out-of-range rows contain
        # garbage (the block overruns the array) and are masked before reducing.
        @pl.when(jnp.logical_not(is_last))
        def _full_block():
            out_ref[...] = _rowsum(f)

        @pl.when(is_last)
        def _ragged_block():
            row_idx = jax.lax.broadcasted_iota(jnp.int32, f.shape, 0)
            out_ref[...] = _rowsum(jnp.where(row_idx < last_rows, f, 0.0))
    else:
        out_ref[...] = _rowsum(f)


def focal_loss(inputs, targets, alpha=1.0, gamma=2.0, *,
               tile_rows=4096, binary_targets=False):
    """Pallas TPU implementation of FocalLoss.forward (reduce=True).

    tile_rows: rows of 128 lanes per grid block.  4096 (f32: 8 MiB
      double-buffered for both streams) is safe on v5e/v6e/v7x with the 32 MiB
      vmem limit set below; v6e/v7x may use 8192.  Must be a multiple of 8
      (32 if you tile sub-32-bit inputs into more than one block).
    binary_targets: enable the exp-saving fast path; ONLY for targets in {0,1}.
    """
    assert inputs.shape == targets.shape
    assert tile_rows % _SUBLANE == 0
    n = int(inputs.size)
    if n == 0:
        return jnp.float32(jnp.nan)      # torch.mean of an empty tensor is NaN

    x = jnp.reshape(inputs, (-1,))
    t = jnp.reshape(targets, (-1,))
    if x.dtype == jnp.bool_:
        x = x.astype(jnp.int8)
    if t.dtype == jnp.bool_:
        t = t.astype(jnp.int8)

    # Aligned main slab handled by the kernel; the <1024-element tail (rare)
    # is a tiny pure-JAX epilogue instead of padding/re-streaming the slab.
    m = (n // _ALIGN) * _ALIGN
    tail_sum = jnp.float32(0.0)
    if m < n:
        tail_sum = jnp.sum(_focal_terms(x[m:], t[m:], alpha, gamma))
    if m == 0:
        # Input smaller than one vreg: the kernel would be pure overhead.
        return tail_sum / jnp.float32(n)

    rows = m // _LANE                     # always a multiple of 8
    xm = (x if m == n else x[:m]).reshape(rows, _LANE)
    tm = (t if m == n else t[:m]).reshape(rows, _LANE)

    tile_r = rows if rows <= tile_rows else tile_rows
    grid = pl.cdiv(rows, tile_r)
    last_rows = rows - (grid - 1) * tile_r   # valid rows in the last block

    kernel = functools.partial(
        _focal_loss_kernel,
        alpha=float(alpha), gamma=float(gamma),
        last_rows=int(last_rows), binary_targets=bool(binary_targets))

    bytes_in = m * (xm.dtype.itemsize + tm.dtype.itemsize)
    cost = pl.CostEstimate(flops=14 * m,
                           transcendentals=3 * m,
                           bytes_accessed=bytes_in + grid * _SUBLANE * _LANE * 4)

    partials = pl.pallas_call(
        kernel,
        out_shape=jax.ShapeDtypeStruct((grid, _SUBLANE, _LANE), jnp.float32),
        grid_spec=pltpu.PrefetchScalarGridSpec(
            num_scalar_prefetch=0,
            grid=(grid,),
            in_specs=[
                pl.BlockSpec((tile_r, _LANE), lambda i: (i, 0)),
                pl.BlockSpec((tile_r, _LANE), lambda i: (i, 0)),
            ],
            # Leading (grid) dim squeezed: kernel writes an (8, 128) block.
            out_specs=pl.BlockSpec((None, _SUBLANE, _LANE), lambda i: (i, 0, 0)),
        ),
        compiler_params=pltpu.CompilerParams(
            dimension_semantics=("parallel",),      # shards across 2 TCs on v7x
            vmem_limit_bytes=32 * 1024 * 1024),
        cost_estimate=cost,
    )(xm, tm)

    # Single tiny cross-lane reduce + divide-by-N, outside the hot loop.
    return (jnp.sum(partials) + tail_sum) / jnp.float32(n)


def _focal_loss_ref(inputs, targets, alpha=1.0, gamma=2.0):
    """Pure-JAX reference (mirrors the PyTorch module) for correctness checks."""
    return jnp.mean(_focal_terms(inputs, targets, alpha, gamma))


if __name__ == "__main__":
    key = jax.random.PRNGKey(0)
    k_in, k_tg = jax.random.split(key)

    # NCHW segmentation-style logits with binary targets.
    inputs = jax.random.normal(k_in, (2, 4, 16, 16), dtype=jnp.float32)
    targets = jax.random.bernoulli(k_tg, 0.5, (2, 4, 16, 16)).astype(jnp.float32)

    ref = jax.block_until_ready(_focal_loss_ref(inputs, targets))

    # 1) Default path (single block, fully aligned).
    loss = jax.block_until_ready(focal_loss(inputs, targets))
    assert jnp.allclose(loss, ref, rtol=1e-5, atol=1e-6), (loss, ref)

    # 2) Multi-block grid path (forces 2 row tiles, per-program partial sums).
    loss_mb = jax.block_until_ready(focal_loss(inputs, targets, tile_rows=8))
    assert jnp.allclose(loss_mb, ref, rtol=1e-5, atol=1e-6), (loss_mb, ref)

    # 3) Ragged size (numel not a multiple of 1024): kernel on aligned prefix,
    #    pure-JAX tail epilogue.
    k_in2, k_tg2 = jax.random.split(jax.random.PRNGKey(0))
    inputs2 = jax.random.normal(k_in2, (3, 809), dtype=jnp.float32)
    targets2 = jax.random.bernoulli(k_tg2, 0.5, (3, 809)).astype(jnp.float32)
    ref2 = jax.block_until_ready(_focal_loss_ref(inputs2, targets2))
    loss2 = jax.block_until_ready(focal_loss(inputs2, targets2, tile_rows=8))
    assert jnp.allclose(loss2, ref2, rtol=1e-5, atol=1e-6), (loss2, ref2)

    # 4) Ragged last row-tile (rows % tile_rows != 0) -> masked last block.
    k_in3, k_tg3 = jax.random.split(jax.random.PRNGKey(1))
    inputs3 = jax.random.normal(k_in3, (5, 1024), dtype=jnp.float32)
    targets3 = jax.random.bernoulli(k_tg3, 0.5, (5, 1024)).astype(jnp.float32)
    ref3 = jax.block_until_ready(_focal_loss_ref(inputs3, targets3))
    loss3 = jax.block_until_ready(focal_loss(inputs3, targets3, tile_rows=16))
    assert jnp.allclose(loss3, ref3, rtol=1e-5, atol=1e-6), (loss3, ref3)

    # 5) Native low-precision dtypes streamed straight into the kernel.
    inputs_bf16 = inputs.astype(jnp.bfloat16)
    ref_bf16 = jax.block_until_ready(_focal_loss_ref(inputs_bf16, targets))
    loss_bf16 = jax.block_until_ready(focal_loss(inputs_bf16, targets))
    assert jnp.allclose(loss_bf16, ref_bf16, rtol=1e-5, atol=1e-6), (loss_bf16, ref_bf16)

    # 6) Binary-targets fast path (one fewer EUP exp; approximate reciprocal).
    loss_bin = jax.block_until_ready(focal_loss(inputs, targets, binary_targets=True))
    assert jnp.allclose(loss_bin, ref, rtol=2e-3, atol=1e-4), (loss_bin, ref)

    print("KERNEL_OK")
</pallas_src>

<mosaic_0001>
module attributes {stable_mosaic.version = 11 : i64} {
  func.func @_focal_loss_kernel(%arg0: i32, %arg1: memref<16x128xf32, #tpu.memory_space<vmem>>, %arg2: memref<16x128xf32, #tpu.memory_space<vmem>>, %arg3: memref<1x8x128xf32, #tpu.memory_space<vmem>>) attributes {dimension_semantics = [#tpu.dimension_semantics<parallel>], iteration_bounds = array<i64: 1>, scalar_prefetch = 0 : i64, scratch_operands = 0 : i64, tpu.core_type = #tpu.core_type<tc>, window_params = [{transform_indices = @transform_0, window_bounds = array<i64: 16, 128>}, {transform_indices = @transform_1, window_bounds = array<i64: 16, 128>}, {transform_indices = @transform_2, window_bounds = array<i64: 1, 8, 128>}]} {
    %c0 = arith.constant 0 : index
    %c0_0 = arith.constant 0 : index
    %0 = vector.load %arg1[%c0, %c0_0] : memref<16x128xf32, #tpu.memory_space<vmem>>, vector<16x128xf32>
    %c0_1 = arith.constant 0 : index
    %c0_2 = arith.constant 0 : index
    %1 = vector.load %arg2[%c0_1, %c0_2] : memref<16x128xf32, #tpu.memory_space<vmem>>, vector<16x128xf32>
    %2 = math.absf %0 : vector<16x128xf32>
    %cst = arith.constant 0.000000e+00 : f32
    %3 = vector.broadcast %cst : f32 to vector<16x128xf32>
    %4 = arith.subf %3, %2 : vector<16x128xf32>
    %5 = math.exp %4 : vector<16x128xf32>
    %cst_3 = arith.constant 0.000000e+00 : f32
    %6 = vector.broadcast %cst_3 : f32 to vector<16x128xf32>
    %7 = arith.maximumf %0, %6 : vector<16x128xf32>
    %8 = arith.mulf %0, %1 : vector<16x128xf32>
    %9 = arith.subf %7, %8 : vector<16x128xf32>
    %10 = math.log1p %5 : vector<16x128xf32>
    %11 = arith.addf %9, %10 : vector<16x128xf32>
    %cst_4 = arith.constant 0.000000e+00 : f32
    %12 = vector.broadcast %cst_4 : f32 to vector<16x128xf32>
    %13 = arith.subf %12, %11 : vector<16x128xf32>
    %14 = math.exp %13 : vector<16x128xf32>
    %cst_5 = arith.constant 1.000000e+00 : f32
    %15 = vector.broadcast %cst_5 : f32 to vector<16x128xf32>
    %16 = arith.subf %15, %14 : vector<16x128xf32>
    %17 = arith.mulf %16, %16 : vector<16x128xf32>
    %18 = arith.mulf %17, %11 : vector<16x128xf32>
    %19 = vector.shape_cast %18 : vector<16x128xf32> to vector<2x8x128xf32>
    %cst_6 = arith.constant dense<0.000000e+00> : vector<8x128xf32>
    %20 = vector.multi_reduction <add>, %19, %cst_6 [0] : vector<2x8x128xf32> to vector<8x128xf32>
    %c0_7 = arith.constant 0 : index
    %c0_8 = arith.constant 0 : index
    %c0_9 = arith.constant 0 : index
    %21 = vector.load %arg3[%c0_7, %c0_8, %c0_9] : memref<1x8x128xf32, #tpu.memory_space<vmem>>, vector<1x8x128xf32>
    %22 = vector.shape_cast %21 : vector<1x8x128xf32> to vector<8x128xf32>
    %23 = vector.shape_cast %20 : vector<8x128xf32> to vector<1x8x128xf32>
    tpu.vector_store %arg3[%c0_7, %c0_8, %c0_9], %23 {strides = array<i32>} : memref<1x8x128xf32, #tpu.memory_space<vmem>>, vector<1x8x128xf32>,
    return
  }
  func.func @transform_0(%arg0: i32) -> (i32, i32) {
    %c0_i32 = arith.constant 0 : i32
    %c0_i32_0 = arith.constant 0 : i32
    return %arg0, %c0_i32 : i32, i32
  }
  func.func @transform_1(%arg0: i32) -> (i32, i32) {
    %c0_i32 = arith.constant 0 : i32
    %c0_i32_0 = arith.constant 0 : i32
    return %arg0, %c0_i32 : i32, i32
  }
  func.func @transform_2(%arg0: i32) -> (i32, i32, i32) {
    %c0_i32 = arith.constant 0 : i32
    %c0_i32_0 = arith.constant 0 : i32
    %c0_i32_1 = arith.constant 0 : i32
    return %arg0, %c0_i32, %c0_i32_0 : i32, i32, i32
  }
}

</mosaic_0001>

<bundles_post_ra>
// kernel: tpu_custom_call.1
= control target key start
LH: loop header
LB: loop body
LE: loop exit
PB: predicated region body
PF: predicated region fallthrough
CT: control target
= control target key end

     0   :  { %7 = vsyncpa [#allocation3], 0  ;;  %s253_s0 = inlined_call_operand.hbm [shape: f32[16,128], index: 0, kind: input, shape index: {}]   ;;  %s254_s1 = inlined_call_operand.hbm [shape: f32[16,128], index: 1, kind: input, shape index: {}]   ;;  %s255_s2 = inlined_call_operand.hbm [shape: f32[1,8,128], index: 2, kind: output, shape index: {}]  }
   0x1   :  { %8 = vsyncpa [#allocation6], 0 }
   0x2   :  { %9 = vsyncpa [#allocation4], 0  ;;  %s197_s9 = smov [#allocation2]   ;;  %s125_s13 = scalar_lea.hbm %s253_s0, 256 }
   0x3   :  { %s15_s10 = sshll.u32 %s197_s9, 4  ;;  %p126_p0 = scmp.ne.s32.totalorder %s253_s0, %s125_s13  ;;  %s16_s10 = int_to_ptr.vmem [resolvable:$true] %s15_s10 }
   0x4   :  { %p129_p1 = scmp.lt.u32.totalorder %s125_s13, %s253_s0 }
   0x6   :  { %p131_p2 = pnand %p129_p1, %p126_p0 }
   0x8   :  { %134 = shalt.err (!%p131_p2)
}
   0x9   :  { %s135_s18 = scalar_lea.vmem %s16_s10, 256  ;;  %p140_p4 = scmp.lt.s32.totalorder %s16_s10, %s16_s10 }
   0xa   :  { %p136_p3 = scmp.ne.s32.totalorder %s16_s10, %s135_s18  ;;  %p141_p5 = scmp.lt.s32.totalorder %s135_s18, %s135_s18 }
   0xc   :  { %p142_p6 = por %p141_p5, %p140_p4 }
   0xe   :  { %p143_p7 = pnand %p142_p6, %p136_p3 }
  0x10   :  { %146 = shalt.err (!%p143_p7)
}
  0x11   :  { %s198_s19 = smov 128   ;;  %s199_s20 = smov 8  }
  0x12   :  { %21 = dma.hbm_to_vmem [thread:$0]  %s253_s0, 256, %s16_s10, [#allocation3], %s198_s19, %s198_s19, %s199_s20  }
  0x13   :  { %s200_s23 = smov [#allocation5]   ;;  %s147_s27 = scalar_lea.hbm %s254_s1, 256 }
  0x14   :  { %s27_s24 = sshll.u32 %s200_s23, 4  ;;  %p148_p8 = scmp.ne.s32.totalorder %s254_s1, %s147_s27  ;;  %s28_s24 = int_to_ptr.vmem [resolvable:$true] %s27_s24 }
  0x15   :  { %p151_p9 = scmp.lt.u32.totalorder %s147_s27, %s254_s1 }
  0x17   :  { %p153_p10 = pnand %p151_p9, %p148_p8 }
  0x19   :  { %156 = shalt.err (!%p153_p10)
}
  0x1a   :  { %s157_s4 = scalar_lea.vmem %s28_s24, 256  ;;  %p162_p12 = scmp.lt.s32.totalorder %s28_s24, %s28_s24 }
  0x1b   :  { %p158_p11 = scmp.ne.s32.totalorder %s28_s24, %s157_s4  ;;  %p163_p13 = scmp.lt.s32.totalorder %s157_s4, %s157_s4 }
  0x1d   :  { %p164_p0 = por %p163_p13, %p162_p12 }
  0x1f   :  { %p165_p1 = pnand %p164_p0, %p158_p11 }
  0x21   :  { %168 = shalt.err (!%p165_p1)
}
  0x22   :  { %33 = dma.hbm_to_vmem [thread:$0]  %s254_s1, 256, %s28_s24, [#allocation6], %s198_s19, %s198_s19, %s199_s20  }
  0x23   :  { %191 = dma.done.wait [#allocation3], 256  }
  0x24   :  { %192 = vsyncadd [#allocation3], 4294967040 }
  0x25   :  { %193 = dma.done.wait [#allocation6], 256  }
  0x26   :  { %194 = vsyncadd [#allocation6], 4294967040  ;;  %v40_v0 = vld [vmem:[#allocation2] sm:$0xff]  ;;  %v41_v1 = vld [vmem:[#allocation2 + $0x8] sm:$0xff]  ;;  %s201_s1 = smov [#allocation7]  }
  0x27   :  { %v44_v2 = vand.u32 2147483647, %v40_v0  ;;  %v45_v3 = vand.u32 2147483647, %v41_v1  ;;  %v42_v14 = vld [vmem:[#allocation5] sm:$0xff]  ;;  %v43_v15 = vld [vmem:[#allocation5 + $0x8] sm:$0xff] }
  0x28   :  { %v52_v17 = vmax.f32 %v40_v0, 0.0  ;;  %v54_v18 = vmul.f32 %v42_v14, %v40_v0  ;;  %v53_v21 = vmax.f32 %v41_v1, 0.0  ;;  %v55_v22 = vmul.f32 %v43_v15, %v41_v1  ;;  %s98_s6 = sshll.u32 %s201_s1, 4  ;;  %s99_s6 = int_to_ptr.vmem [resolvable:$true] %s98_s6 }
  0x29   :  { %v46_v4 = vsub.f32 0.0, %v44_v2  ;;  %v47_v5 = vsub.f32 0.0, %v45_v3  ;;  %s169_s7 = scalar_lea.vmem %s99_s6, 128  ;;  %p174_p3 = scmp.lt.s32.totalorder %s99_s6, %s99_s6 }
  0x2a   :  { %v56_v26 = vsub.f32 %v52_v17, %v54_v18  ;;  %v57_v29 = vsub.f32 %v53_v21, %v55_v22  ;;  %p170_p2 = scmp.ne.s32.totalorder %s99_s6, %s169_s7  ;;  %p175_p4 = scmp.lt.s32.totalorder %s169_s7, %s169_s7 }
  0x2b   :  { %v48_v6 = vmul.f32 1.442695, %v46_v4  ;;  %v50_v7 = vmul.f32 1.442695, %v47_v5 }
  0x2c   :  { %p176_p5 = por %p175_p4, %p174_p3 }
  0x2d   :  { %113 = vpow2.f32 %v48_v6 }
  0x2e   :  { %115 = vpow2.f32 %v50_v7  ;;  %p177_p6 = pnand %p176_p5, %p170_p2 }
  0x37   :  { %v114_v8 = vpop.eup %113 }
  0x38   :  { %v116_v9 = vpop.eup %115  ;;  %v58_v10 = vadd.f32 1.0, %v114_v8  ;;  %v61_v12 = vmul.f32 -0.5, %v114_v8  ;;  %v64_v19 = vand.u32 2147483647, %v114_v8 }
  0x39   :  { %v67_v11 = vadd.f32 1.0, %v116_v9  ;;  %v70_v13 = vmul.f32 -0.5, %v116_v9  ;;  %v73_v23 = vand.u32 2147483647, %v116_v9 }
  0x3a   :  { %117 = vlog2.f32 %v58_v10  ;;  %v62_v16 = vadd.f32 1.0, %v61_v12  ;;  %vm65_vm0 = vcmp.lt.f32.partialorder %v64_v19, 0.0004427343 }
  0x3b   :  { %119 = vlog2.f32 %v67_v11  ;;  %v71_v20 = vadd.f32 1.0, %v70_v13  ;;  %vm74_vm1 = vcmp.lt.f32.partialorder %v73_v23, 0.0004427343 }
  0x3c   :  { %v63_v24 = vmul.f32 %v114_v8, %v62_v16 }
  0x3d   :  { %v72_v27 = vmul.f32 %v116_v9, %v71_v20 }
  0x44   :  { %v118_v25 = vpop.eup %117 }
  0x45   :  { %v120_v28 = vpop.eup %119  ;;  %v60_v30 = vmul.f32 0.6931472, %v118_v25 }
  0x46   :  { %v69_v31 = vmul.f32 0.6931472, %v120_v28 }
  0x47   :  { %v66_v32 = vsel %vm65_vm0, %v63_v24, %v60_v30 }
  0x48   :  { %v75_v33 = vsel %vm74_vm1, %v72_v27, %v69_v31  ;;  %v76_v34 = vadd.f32 %v66_v32, %v56_v26 }
  0x49   :  { %v77_v35 = vadd.f32 %v75_v33, %v57_v29 }
  0x4a   :  { %v78_v36 = vsub.f32 0.0, %v76_v34 }
  0x4b   :  { %v79_v37 = vsub.f32 0.0, %v77_v35 }
  0x4c   :  { %v80_v38 = vmul.f32 1.442695, %v78_v36 }
  0x4d   :  { %v82_v39 = vmul.f32 1.442695, %v79_v37 }
  0x4e   :  { %121 = vpow2.f32 %v80_v38 }
  0x4f   :  { %123 = vpow2.f32 %v82_v39 }
  0x58   :  { %v122_v40 = vpop.eup %121 }
  0x59   :  { %v124_v41 = vpop.eup %123  ;;  %v84_v42 = vsub.f32 1.0, %v122_v40 }
  0x5a   :  { %v85_v43 = vsub.f32 1.0, %v124_v41 }
  0x5b   :  { %v86_v44 = vmul.f32 %v84_v42, %v84_v42 }
  0x5c   :  { %v87_v45 = vmul.f32 %v85_v43, %v85_v43 }
  0x5d   :  { %v88_v46 = vmul.f32 %v86_v44, %v76_v34 }
  0x5e   :  { %v89_v47 = vmul.f32 %v87_v45, %v77_v35 }
  0x60   :  { %v90_v48 = vadd.f32 %v89_v47, %v88_v46 }
  0x62   :  { %91 = vst [vmem:[#allocation7] sm:$0xff] %v90_v48 }
  0x63   :  { %180 = shalt.err (!%p177_p6)
}
  0x64   :  { %s181_s10 = scalar_lea.hbm %s255_s2, 128 }
  0x65   :  { %p182_p7 = scmp.ne.s32.totalorder %s255_s2, %s181_s10  ;;  %p185_p8 = scmp.lt.u32.totalorder %s181_s10, %s255_s2 }
  0x67   :  { %p187_p9 = pnand %p185_p8, %p182_p7 }
  0x69   :  { %190 = shalt.err (!%p187_p9)
}
  0x6a   :  { %101 = dma.vmem_to_hbm [thread:$0]  %s99_s6, 128, %s255_s2, [#allocation4]  }
  0x6b   :  { %195 = dma.done.wait [#allocation4], 128  }
  0x6c   :  { %196 = vsyncadd [#allocation4], 4294967168 }
  0x6d   :  { %105 = vsyncpa [#allocation3], 1 }
  0x6e   :  { %106 = vsyncpa [#allocation6], 1 }
  0x6f   :  { %107 = vsyncpa [#allocation4], 1 }

</bundles_post_ra>
